<compile_context>
chip_gen: v7x
topology: tpu7x:2x2x1
jax: 0.10.0
libtpu: 0.0.40
codegen_flags: <defaults>
</compile_context>

<pallas_src>
import jax
import jax.numpy as jnp
from jax.experimental import pallas as pl
from jax.experimental.pallas import tpu as pltpu

FEAT_COMP_DIM = 102
FEAT_LOC_DIM = 23
COMMON_DIM = 64
NUM_CLASSES = 2
PACKED_OUT_DIM = 4 * COMMON_DIM  # 256 lanes: comp | loc | comp_loc | cls(padded)


def _leaky(x):
    # nn.LeakyReLU default negative_slope = 0.01
    return jnp.where(x >= 0, x, 0.01 * x)


def _round_up(n, m):
    return ((n + m - 1) // m) * m


def naive_dl_kernel(
    feat_comp_ref, feat_loc_ref,
    w_c1_ref, b_c1_ref, w_c2_ref, b_c2_ref, w_c3_ref, b_c3_ref,
    w_l1_ref, b_l1_ref, w_l2_ref, b_l2_ref,
    w_sh_comp_ref, w_sh_loc_ref, b_sh_ref,
    w_clf_ref,
    out_ref,
):
    def dot(x, w_ref):
        # bf16 operands for the MXU, f32 accumulation; all elementwise work
        # (bias add, LeakyReLU) stays in f32 (v5e has no bf16 VALU).
        return jnp.dot(x.astype(jnp.bfloat16), w_ref[...],
                       preferred_element_type=jnp.float32)

    # --- net_comp: 102 -> 256 -> 128 -> 64, LeakyReLU after each layer ---
    h = _leaky(dot(feat_comp_ref[...], w_c1_ref) + b_c1_ref[...])
    h = _leaky(dot(h, w_c2_ref) + b_c2_ref[...])
    comp = _leaky(dot(h, w_c3_ref) + b_c3_ref[...])            # [rows, 64]

    # --- net_loc: 23 -> 64 -> 64, LeakyReLU after each layer ---
    hl = _leaky(dot(feat_loc_ref[...], w_l1_ref) + b_l1_ref[...])
    loc = _leaky(dot(hl, w_l2_ref) + b_l2_ref[...])            # [rows, 64]

    # --- net_shared on concat([comp, loc], dim=1): split matmul ---
    shared = _leaky(dot(comp, w_sh_comp_ref) + dot(loc, w_sh_loc_ref)
                    + b_sh_ref[...])                            # [rows, 64]

    # --- classifier: bias-free Linear(64 -> 2), weight padded to (64, 64) ---
    cls = dot(shared, w_clf_ref)                                # [rows, 64]

    # Single lane-dense packed output (one output DMA per row tile).
    out_ref[:, 0:COMMON_DIM] = comp
    out_ref[:, COMMON_DIM:2 * COMMON_DIM] = loc
    out_ref[:, 2 * COMMON_DIM:3 * COMMON_DIM] = shared
    out_ref[:, 3 * COMMON_DIM:4 * COMMON_DIM] = cls


def naive_dl_forward(feat_comp, feat_loc, params, *, max_row_tile=256):
    assert feat_comp.shape[1] == FEAT_COMP_DIM
    assert feat_loc.shape[1] == FEAT_LOC_DIM
    B = feat_comp.shape[0]

    # Row tile: full (8-padded) batch when small, 256-row tiles when batched.
    row_tile = min(max_row_tile, _round_up(B, 8))
    B_pad = _round_up(B, row_tile)

    feat_comp_p = jnp.zeros((B_pad, FEAT_COMP_DIM), jnp.float32).at[:B].set(
        feat_comp.astype(jnp.float32))
    feat_loc_p = jnp.zeros((B_pad, FEAT_LOC_DIM), jnp.float32).at[:B].set(
        feat_loc.astype(jnp.float32))

    bf16 = lambda x: x.astype(jnp.bfloat16)
    # Zero-pad the (64, 2) classifier weight to (64, 64): extra columns produce
    # zeros that the wrapper slices away -> full-lane store slab in the kernel.
    w_clf_pad = jnp.zeros((COMMON_DIM, COMMON_DIM), jnp.float32)
    w_clf_pad = w_clf_pad.at[:, :NUM_CLASSES].set(params["w_clf"])

    weight_args = [
        bf16(params["w_c1"]), params["b_c1"],
        bf16(params["w_c2"]), params["b_c2"],
        bf16(params["w_c3"]), params["b_c3"],
        bf16(params["w_l1"]), params["b_l1"],
        bf16(params["w_l2"]), params["b_l2"],
        bf16(params["w_sh"][:COMMON_DIM]),      # rows multiplying comp
        bf16(params["w_sh"][COMMON_DIM:]),      # rows multiplying loc
        params["b_sh"],
        bf16(w_clf_pad),
    ]

    grid = (B_pad // row_tile,)
    row_spec = lambda cols: pl.BlockSpec((row_tile, cols), lambda i: (i, 0))
    # Constant block index -> weights DMA'd once, VMEM-resident across the grid.
    const_spec = lambda a: pl.BlockSpec(a.shape, lambda i: (0, 0))

    packed = pl.pallas_call(
        naive_dl_kernel,
        out_shape=jax.ShapeDtypeStruct((B_pad, PACKED_OUT_DIM), jnp.float32),
        grid=grid,
        in_specs=[row_spec(FEAT_COMP_DIM), row_spec(FEAT_LOC_DIM)]
                 + [const_spec(a) for a in weight_args],
        out_specs=row_spec(PACKED_OUT_DIM),
        compiler_params=pltpu.CompilerParams(
            dimension_semantics=("parallel",)),
    )(feat_comp_p, feat_loc_p, *weight_args)

    return {
        "comp_feat": packed[:B, 0:COMMON_DIM],
        "loc_feat": packed[:B, COMMON_DIM:2 * COMMON_DIM],
        "comp_loc_feat": packed[:B, 2 * COMMON_DIM:3 * COMMON_DIM],
        "outputs": packed[:B, 3 * COMMON_DIM:3 * COMMON_DIM + NUM_CLASSES],
    }


def init_params(key):
    # Deterministic synthetic init (mimics torch's U(-1/sqrt(fan_in), 1/sqrt(fan_in))).
    shapes = {
        "w_c1": (FEAT_COMP_DIM, 256), "b_c1": (1, 256),
        "w_c2": (256, 128), "b_c2": (1, 128),
        "w_c3": (128, COMMON_DIM), "b_c3": (1, COMMON_DIM),
        "w_l1": (FEAT_LOC_DIM, 64), "b_l1": (1, 64),
        "w_l2": (64, COMMON_DIM), "b_l2": (1, COMMON_DIM),
        "w_sh": (2 * COMMON_DIM, COMMON_DIM), "b_sh": (1, COMMON_DIM),
        "w_clf": (COMMON_DIM, NUM_CLASSES),
    }
    params = {}
    names = sorted(shapes.keys())
    keys = jax.random.split(key, len(names))
    for k_rng, name in zip(keys, names):
        shape = shapes[name]
        fan_in = shape[0] if name.startswith("w") else max(shape[1], 1)
        scale = 1.0 / float(fan_in) ** 0.5
        params[name] = jax.random.uniform(k_rng, shape, jnp.float32, -scale, scale)
    return params


if __name__ == "__main__":
    B = 8
    key = jax.random.PRNGKey(0)
    k1, k2, kp = jax.random.split(key, 3)

    feat_comp = jax.random.normal(k1, (B, FEAT_COMP_DIM), jnp.float32)
    feat_loc = jax.random.normal(k2, (B, FEAT_LOC_DIM), jnp.float32)
    params = init_params(kp)

    out = naive_dl_forward(feat_comp, feat_loc, params)
    jax.block_until_ready(out)

    assert out["comp_feat"].shape == (B, COMMON_DIM)
    assert out["loc_feat"].shape == (B, COMMON_DIM)
    assert out["comp_loc_feat"].shape == (B, COMMON_DIM)
    assert out["outputs"].shape == (B, NUM_CLASSES)
    print("KERNEL_OK")
</pallas_src>

<mosaic_0001>
module attributes {stable_mosaic.version = 11 : i64} {
  func.func @naive_dl_kernel(%arg0: i32, %arg1: memref<8x102xf32, #tpu.memory_space<vmem>>, %arg2: memref<8x23xf32, #tpu.memory_space<vmem>>, %arg3: memref<102x256xbf16, #tpu.memory_space<vmem>>, %arg4: memref<1x256xf32, #tpu.memory_space<vmem>>, %arg5: memref<256x128xbf16, #tpu.memory_space<vmem>>, %arg6: memref<1x128xf32, #tpu.memory_space<vmem>>, %arg7: memref<128x64xbf16, #tpu.memory_space<vmem>>, %arg8: memref<1x64xf32, #tpu.memory_space<vmem>>, %arg9: memref<23x64xbf16, #tpu.memory_space<vmem>>, %arg10: memref<1x64xf32, #tpu.memory_space<vmem>>, %arg11: memref<64x64xbf16, #tpu.memory_space<vmem>>, %arg12: memref<1x64xf32, #tpu.memory_space<vmem>>, %arg13: memref<64x64xbf16, #tpu.memory_space<vmem>>, %arg14: memref<64x64xbf16, #tpu.memory_space<vmem>>, %arg15: memref<1x64xf32, #tpu.memory_space<vmem>>, %arg16: memref<64x64xbf16, #tpu.memory_space<vmem>>, %arg17: memref<8x256xf32, #tpu.memory_space<vmem>>) attributes {dimension_semantics = [#tpu.dimension_semantics<parallel>], iteration_bounds = array<i64: 1>, scalar_prefetch = 0 : i64, scratch_operands = 0 : i64, tpu.core_type = #tpu.core_type<tc>, window_params = [{transform_indices = @transform_0, window_bounds = array<i64: 8, 102>}, {transform_indices = @transform_1, window_bounds = array<i64: 8, 23>}, {pipeline_mode = #tpu.pipeline_mode<synchronous>, transform_indices = @transform_2, window_bounds = array<i64: 102, 256>}, {pipeline_mode = #tpu.pipeline_mode<synchronous>, transform_indices = @transform_3, window_bounds = array<i64: 1, 256>}, {pipeline_mode = #tpu.pipeline_mode<synchronous>, transform_indices = @transform_4, window_bounds = array<i64: 256, 128>}, {pipeline_mode = #tpu.pipeline_mode<synchronous>, transform_indices = @transform_5, window_bounds = array<i64: 1, 128>}, {pipeline_mode = #tpu.pipeline_mode<synchronous>, transform_indices = @transform_6, window_bounds = array<i64: 128, 64>}, {pipeline_mode = #tpu.pipeline_mode<synchronous>, transform_indices = @transform_7, window_bounds = array<i64: 1, 64>}, {pipeline_mode = #tpu.pipeline_mode<synchronous>, transform_indices = @transform_8, window_bounds = array<i64: 23, 64>}, {pipeline_mode = #tpu.pipeline_mode<synchronous>, transform_indices = @transform_9, window_bounds = array<i64: 1, 64>}, {pipeline_mode = #tpu.pipeline_mode<synchronous>, transform_indices = @transform_10, window_bounds = array<i64: 64, 64>}, {pipeline_mode = #tpu.pipeline_mode<synchronous>, transform_indices = @transform_11, window_bounds = array<i64: 1, 64>}, {pipeline_mode = #tpu.pipeline_mode<synchronous>, transform_indices = @transform_12, window_bounds = array<i64: 64, 64>}, {pipeline_mode = #tpu.pipeline_mode<synchronous>, transform_indices = @transform_13, window_bounds = array<i64: 64, 64>}, {pipeline_mode = #tpu.pipeline_mode<synchronous>, transform_indices = @transform_14, window_bounds = array<i64: 1, 64>}, {pipeline_mode = #tpu.pipeline_mode<synchronous>, transform_indices = @transform_15, window_bounds = array<i64: 64, 64>}, {transform_indices = @transform_16, window_bounds = array<i64: 8, 256>}]} {
    %c0 = arith.constant 0 : index
    %c0_0 = arith.constant 0 : index
    %0 = vector.load %arg1[%c0, %c0_0] : memref<8x102xf32, #tpu.memory_space<vmem>>, vector<8x102xf32>
    %1 = arith.truncf %0 : vector<8x102xf32> to vector<8x102xbf16>
    %c0_1 = arith.constant 0 : index
    %c0_2 = arith.constant 0 : index
    %2 = vector.load %arg3[%c0_1, %c0_2] : memref<102x256xbf16, #tpu.memory_space<vmem>>, vector<102x256xbf16>
    %cst = arith.constant dense<0.000000e+00> : vector<8x256xf32>
    %3 = tpu.matmul %1, %2, %cst {dimension_numbers = #tpu.dot_dimension_numbers<[1], [0], [0], [1], [0, 0, 1, 1], [], []>} : vector<8x102xbf16>, vector<102x256xbf16>, vector<8x256xf32> -> vector<8x256xf32>
    %c0_3 = arith.constant 0 : index
    %c0_4 = arith.constant 0 : index
    %4 = vector.load %arg4[%c0_3, %c0_4] : memref<1x256xf32, #tpu.memory_space<vmem>>, vector<1x256xf32>
    %5 = vector.broadcast %4 : vector<1x256xf32> to vector<8x256xf32>
    %6 = arith.addf %3, %5 : vector<8x256xf32>
    %cst_5 = arith.constant 0.000000e+00 : f32
    %7 = vector.broadcast %cst_5 : f32 to vector<8x256xf32>
    %8 = arith.cmpf oge, %6, %7 : vector<8x256xf32>
    %cst_6 = arith.constant 0.00999999977 : f32
    %9 = vector.broadcast %cst_6 : f32 to vector<8x256xf32>
    %10 = arith.mulf %9, %6 : vector<8x256xf32>
    %11 = arith.select %8, %6, %10 : vector<8x256xi1>, vector<8x256xf32>
    %12 = arith.truncf %11 : vector<8x256xf32> to vector<8x256xbf16>
    %c0_7 = arith.constant 0 : index
    %c0_8 = arith.constant 0 : index
    %13 = vector.load %arg5[%c0_7, %c0_8] : memref<256x128xbf16, #tpu.memory_space<vmem>>, vector<256x128xbf16>
    %cst_9 = arith.constant dense<0.000000e+00> : vector<8x128xf32>
    %14 = tpu.matmul %12, %13, %cst_9 {dimension_numbers = #tpu.dot_dimension_numbers<[1], [0], [0], [1], [0, 0, 1, 1], [], []>} : vector<8x256xbf16>, vector<256x128xbf16>, vector<8x128xf32> -> vector<8x128xf32>
    %c0_10 = arith.constant 0 : index
    %c0_11 = arith.constant 0 : index
    %15 = vector.load %arg6[%c0_10, %c0_11] : memref<1x128xf32, #tpu.memory_space<vmem>>, vector<1x128xf32>
    %16 = vector.broadcast %15 : vector<1x128xf32> to vector<8x128xf32>
    %17 = arith.addf %14, %16 : vector<8x128xf32>
    %cst_12 = arith.constant 0.000000e+00 : f32
    %18 = vector.broadcast %cst_12 : f32 to vector<8x128xf32>
    %19 = arith.cmpf oge, %17, %18 : vector<8x128xf32>
    %cst_13 = arith.constant 0.00999999977 : f32
    %20 = vector.broadcast %cst_13 : f32 to vector<8x128xf32>
    %21 = arith.mulf %20, %17 : vector<8x128xf32>
    %22 = arith.select %19, %17, %21 : vector<8x128xi1>, vector<8x128xf32>
    %23 = arith.truncf %22 : vector<8x128xf32> to vector<8x128xbf16>
    %c0_14 = arith.constant 0 : index
    %c0_15 = arith.constant 0 : index
    %24 = vector.load %arg7[%c0_14, %c0_15] : memref<128x64xbf16, #tpu.memory_space<vmem>>, vector<128x64xbf16>
    %cst_16 = arith.constant dense<0.000000e+00> : vector<8x64xf32>
    %25 = tpu.matmul %23, %24, %cst_16 {dimension_numbers = #tpu.dot_dimension_numbers<[1], [0], [0], [1], [0, 0, 1, 1], [], []>} : vector<8x128xbf16>, vector<128x64xbf16>, vector<8x64xf32> -> vector<8x64xf32>
    %c0_17 = arith.constant 0 : index
    %c0_18 = arith.constant 0 : index
    %26 = vector.load %arg8[%c0_17, %c0_18] : memref<1x64xf32, #tpu.memory_space<vmem>>, vector<1x64xf32>
    %27 = vector.broadcast %26 : vector<1x64xf32> to vector<8x64xf32>
    %28 = arith.addf %25, %27 : vector<8x64xf32>
    %cst_19 = arith.constant 0.000000e+00 : f32
    %29 = vector.broadcast %cst_19 : f32 to vector<8x64xf32>
    %30 = arith.cmpf oge, %28, %29 : vector<8x64xf32>
    %cst_20 = arith.constant 0.00999999977 : f32
    %31 = vector.broadcast %cst_20 : f32 to vector<8x64xf32>
    %32 = arith.mulf %31, %28 : vector<8x64xf32>
    %33 = arith.select %30, %28, %32 : vector<8x64xi1>, vector<8x64xf32>
    %c0_21 = arith.constant 0 : index
    %c0_22 = arith.constant 0 : index
    %34 = vector.load %arg2[%c0_21, %c0_22] : memref<8x23xf32, #tpu.memory_space<vmem>>, vector<8x23xf32>
    %35 = arith.truncf %34 : vector<8x23xf32> to vector<8x23xbf16>
    %c0_23 = arith.constant 0 : index
    %c0_24 = arith.constant 0 : index
    %36 = vector.load %arg9[%c0_23, %c0_24] : memref<23x64xbf16, #tpu.memory_space<vmem>>, vector<23x64xbf16>
    %cst_25 = arith.constant dense<0.000000e+00> : vector<8x64xf32>
    %37 = tpu.matmul %35, %36, %cst_25 {dimension_numbers = #tpu.dot_dimension_numbers<[1], [0], [0], [1], [0, 0, 1, 1], [], []>} : vector<8x23xbf16>, vector<23x64xbf16>, vector<8x64xf32> -> vector<8x64xf32>
    %c0_26 = arith.constant 0 : index
    %c0_27 = arith.constant 0 : index
    %38 = vector.load %arg10[%c0_26, %c0_27] : memref<1x64xf32, #tpu.memory_space<vmem>>, vector<1x64xf32>
    %39 = vector.broadcast %38 : vector<1x64xf32> to vector<8x64xf32>
    %40 = arith.addf %37, %39 : vector<8x64xf32>
    %cst_28 = arith.constant 0.000000e+00 : f32
    %41 = vector.broadcast %cst_28 : f32 to vector<8x64xf32>
    %42 = arith.cmpf oge, %40, %41 : vector<8x64xf32>
    %cst_29 = arith.constant 0.00999999977 : f32
    %43 = vector.broadcast %cst_29 : f32 to vector<8x64xf32>
    %44 = arith.mulf %43, %40 : vector<8x64xf32>
    %45 = arith.select %42, %40, %44 : vector<8x64xi1>, vector<8x64xf32>
    %46 = arith.truncf %45 : vector<8x64xf32> to vector<8x64xbf16>
    %c0_30 = arith.constant 0 : index
    %c0_31 = arith.constant 0 : index
    %47 = vector.load %arg11[%c0_30, %c0_31] : memref<64x64xbf16, #tpu.memory_space<vmem>>, vector<64x64xbf16>
    %cst_32 = arith.constant dense<0.000000e+00> : vector<8x64xf32>
    %48 = tpu.matmul %46, %47, %cst_32 {dimension_numbers = #tpu.dot_dimension_numbers<[1], [0], [0], [1], [0, 0, 1, 1], [], []>} : vector<8x64xbf16>, vector<64x64xbf16>, vector<8x64xf32> -> vector<8x64xf32>
    %c0_33 = arith.constant 0 : index
    %c0_34 = arith.constant 0 : index
    %49 = vector.load %arg12[%c0_33, %c0_34] : memref<1x64xf32, #tpu.memory_space<vmem>>, vector<1x64xf32>
    %50 = vector.broadcast %49 : vector<1x64xf32> to vector<8x64xf32>
    %51 = arith.addf %48, %50 : vector<8x64xf32>
    %cst_35 = arith.constant 0.000000e+00 : f32
    %52 = vector.broadcast %cst_35 : f32 to vector<8x64xf32>
    %53 = arith.cmpf oge, %51, %52 : vector<8x64xf32>
    %cst_36 = arith.constant 0.00999999977 : f32
    %54 = vector.broadcast %cst_36 : f32 to vector<8x64xf32>
    %55 = arith.mulf %54, %51 : vector<8x64xf32>
    %56 = arith.select %53, %51, %55 : vector<8x64xi1>, vector<8x64xf32>
    %57 = arith.truncf %33 : vector<8x64xf32> to vector<8x64xbf16>
    %c0_37 = arith.constant 0 : index
    %c0_38 = arith.constant 0 : index
    %58 = vector.load %arg13[%c0_37, %c0_38] : memref<64x64xbf16, #tpu.memory_space<vmem>>, vector<64x64xbf16>
    %cst_39 = arith.constant dense<0.000000e+00> : vector<8x64xf32>
    %59 = tpu.matmul %57, %58, %cst_39 {dimension_numbers = #tpu.dot_dimension_numbers<[1], [0], [0], [1], [0, 0, 1, 1], [], []>} : vector<8x64xbf16>, vector<64x64xbf16>, vector<8x64xf32> -> vector<8x64xf32>
    %60 = arith.truncf %56 : vector<8x64xf32> to vector<8x64xbf16>
    %c0_40 = arith.constant 0 : index
    %c0_41 = arith.constant 0 : index
    %61 = vector.load %arg14[%c0_40, %c0_41] : memref<64x64xbf16, #tpu.memory_space<vmem>>, vector<64x64xbf16>
    %cst_42 = arith.constant dense<0.000000e+00> : vector<8x64xf32>
    %62 = tpu.matmul %60, %61, %cst_42 {dimension_numbers = #tpu.dot_dimension_numbers<[1], [0], [0], [1], [0, 0, 1, 1], [], []>} : vector<8x64xbf16>, vector<64x64xbf16>, vector<8x64xf32> -> vector<8x64xf32>
    %63 = arith.addf %59, %62 : vector<8x64xf32>
    %c0_43 = arith.constant 0 : index
    %c0_44 = arith.constant 0 : index
    %64 = vector.load %arg15[%c0_43, %c0_44] : memref<1x64xf32, #tpu.memory_space<vmem>>, vector<1x64xf32>
    %65 = vector.broadcast %64 : vector<1x64xf32> to vector<8x64xf32>
    %66 = arith.addf %63, %65 : vector<8x64xf32>
    %cst_45 = arith.constant 0.000000e+00 : f32
    %67 = vector.broadcast %cst_45 : f32 to vector<8x64xf32>
    %68 = arith.cmpf oge, %66, %67 : vector<8x64xf32>
    %cst_46 = arith.constant 0.00999999977 : f32
    %69 = vector.broadcast %cst_46 : f32 to vector<8x64xf32>
    %70 = arith.mulf %69, %66 : vector<8x64xf32>
    %71 = arith.select %68, %66, %70 : vector<8x64xi1>, vector<8x64xf32>
    %72 = arith.truncf %71 : vector<8x64xf32> to vector<8x64xbf16>
    %c0_47 = arith.constant 0 : index
    %c0_48 = arith.constant 0 : index
    %73 = vector.load %arg16[%c0_47, %c0_48] : memref<64x64xbf16, #tpu.memory_space<vmem>>, vector<64x64xbf16>
    %cst_49 = arith.constant dense<0.000000e+00> : vector<8x64xf32>
    %74 = tpu.matmul %72, %73, %cst_49 {dimension_numbers = #tpu.dot_dimension_numbers<[1], [0], [0], [1], [0, 0, 1, 1], [], []>} : vector<8x64xbf16>, vector<64x64xbf16>, vector<8x64xf32> -> vector<8x64xf32>
    %c0_50 = arith.constant 0 : index
    %c0_51 = arith.constant 0 : index
    %75 = vector.load %arg17[%c0_50, %c0_51] : memref<8x256xf32, #tpu.memory_space<vmem>>, vector<8x64xf32>
    tpu.vector_store %arg17[%c0_50, %c0_51], %33 {strides = array<i32>} : memref<8x256xf32, #tpu.memory_space<vmem>>, vector<8x64xf32>,
    %c0_52 = arith.constant 0 : index
    %c64 = arith.constant 64 : index
    %76 = vector.load %arg17[%c0_52, %c64] : memref<8x256xf32, #tpu.memory_space<vmem>>, vector<8x64xf32>
    tpu.vector_store %arg17[%c0_52, %c64], %56 {strides = array<i32>} : memref<8x256xf32, #tpu.memory_space<vmem>>, vector<8x64xf32>,
    %c0_53 = arith.constant 0 : index
    %c128 = arith.constant 128 : index
    %77 = vector.load %arg17[%c0_53, %c128] : memref<8x256xf32, #tpu.memory_space<vmem>>, vector<8x64xf32>
    tpu.vector_store %arg17[%c0_53, %c128], %71 {strides = array<i32>} : memref<8x256xf32, #tpu.memory_space<vmem>>, vector<8x64xf32>,
    %c0_54 = arith.constant 0 : index
    %c192 = arith.constant 192 : index
    %78 = vector.load %arg17[%c0_54, %c192] : memref<8x256xf32, #tpu.memory_space<vmem>>, vector<8x64xf32>
    tpu.vector_store %arg17[%c0_54, %c192], %74 {strides = array<i32>} : memref<8x256xf32, #tpu.memory_space<vmem>>, vector<8x64xf32>,
    return
  }
  func.func @transform_0(%arg0: i32) -> (i32, i32) {
    %c0_i32 = arith.constant 0 : i32
    %c0_i32_0 = arith.constant 0 : i32
    return %arg0, %c0_i32 : i32, i32
  }
  func.func @transform_1(%arg0: i32) -> (i32, i32) {
    %c0_i32 = arith.constant 0 : i32
    %c0_i32_0 = arith.constant 0 : i32
    return %arg0, %c0_i32 : i32, i32
  }
  func.func @transform_2(%arg0: i32) -> (i32, i32) {
    %c0_i32 = arith.constant 0 : i32
    %c0_i32_0 = arith.constant 0 : i32
    %c0_i32_1 = arith.constant 0 : i32
    return %c0_i32, %c0_i32_0 : i32, i32
  }
  func.func @transform_3(%arg0: i32) -> (i32, i32) {
    %c0_i32 = arith.constant 0 : i32
    %c0_i32_0 = arith.constant 0 : i32
    %c0_i32_1 = arith.constant 0 : i32
    return %c0_i32, %c0_i32_0 : i32, i32
  }
  func.func @transform_4(%arg0: i32) -> (i32, i32) {
    %c0_i32 = arith.constant 0 : i32
    %c0_i32_0 = arith.constant 0 : i32
    %c0_i32_1 = arith.constant 0 : i32
    return %c0_i32, %c0_i32_0 : i32, i32
  }
  func.func @transform_5(%arg0: i32) -> (i32, i32) {
    %c0_i32 = arith.constant 0 : i32
    %c0_i32_0 = arith.constant 0 : i32
    %c0_i32_1 = arith.constant 0 : i32
    return %c0_i32, %c0_i32_0 : i32, i32
  }
  func.func @transform_6(%arg0: i32) -> (i32, i32) {
    %c0_i32 = arith.constant 0 : i32
    %c0_i32_0 = arith.constant 0 : i32
    %c0_i32_1 = arith.constant 0 : i32
    return %c0_i32, %c0_i32_0 : i32, i32
  }
  func.func @transform_7(%arg0: i32) -> (i32, i32) {
    %c0_i32 = arith.constant 0 : i32
    %c0_i32_0 = arith.constant 0 : i32
    %c0_i32_1 = arith.constant 0 : i32
    return %c0_i32, %c0_i32_0 : i32, i32
  }
  func.func @transform_8(%arg0: i32) -> (i32, i32) {
    %c0_i32 = arith.constant 0 : i32
    %c0_i32_0 = arith.constant 0 : i32
    %c0_i32_1 = arith.constant 0 : i32
    return %c0_i32, %c0_i32_0 : i32, i32
  }
  func.func @transform_9(%arg0: i32) -> (i32, i32) {
    %c0_i32 = arith.constant 0 : i32
    %c0_i32_0 = arith.constant 0 : i32
    %c0_i32_1 = arith.constant 0 : i32
    return %c0_i32, %c0_i32_0 : i32, i32
  }
  func.func @transform_10(%arg0: i32) -> (i32, i32) {
    %c0_i32 = arith.constant 0 : i32
    %c0_i32_0 = arith.constant 0 : i32
    %c0_i32_1 = arith.constant 0 : i32
    return %c0_i32, %c0_i32_0 : i32, i32
  }
  func.func @transform_11(%arg0: i32) -> (i32, i32) {
    %c0_i32 = arith.constant 0 : i32
    %c0_i32_0 = arith.constant 0 : i32
    %c0_i32_1 = arith.constant 0 : i32
    return %c0_i32, %c0_i32_0 : i32, i32
  }
  func.func @transform_12(%arg0: i32) -> (i32, i32) {
    %c0_i32 = arith.constant 0 : i32
    %c0_i32_0 = arith.constant 0 : i32
    %c0_i32_1 = arith.constant 0 : i32
    return %c0_i32, %c0_i32_0 : i32, i32
  }
  func.func @transform_13(%arg0: i32) -> (i32, i32) {
    %c0_i32 = arith.constant 0 : i32
    %c0_i32_0 = arith.constant 0 : i32
    %c0_i32_1 = arith.constant 0 : i32
    return %c0_i32, %c0_i32_0 : i32, i32
  }
  func.func @transform_14(%arg0: i32) -> (i32, i32) {
    %c0_i32 = arith.constant 0 : i32
    %c0_i32_0 = arith.constant 0 : i32
    %c0_i32_1 = arith.constant 0 : i32
    return %c0_i32, %c0_i32_0 : i32, i32
  }
  func.func @transform_15(%arg0: i32) -> (i32, i32) {
    %c0_i32 = arith.constant 0 : i32
    %c0_i32_0 = arith.constant 0 : i32
    %c0_i32_1 = arith.constant 0 : i32
    return %c0_i32, %c0_i32_0 : i32, i32
  }
  func.func @transform_16(%arg0: i32) -> (i32, i32) {
    %c0_i32 = arith.constant 0 : i32
    %c0_i32_0 = arith.constant 0 : i32
    return %arg0, %c0_i32 : i32, i32
  }
}

</mosaic_0001>

<bundles_post_ra>
// kernel: tpu_custom_call.1
= control target key start
LH: loop header
LB: loop body
LE: loop exit
PB: predicated region body
PF: predicated region fallthrough
CT: control target
= control target key end

     0   :  { %s1874_s0 = inlined_call_operand.hbm [shape: f32[8,102], index: 0, kind: input, shape index: {}]   ;;  %s1875_s1 = inlined_call_operand.hbm [shape: f32[8,23], index: 1, kind: input, shape index: {}]   ;;  %s1876_s2 = inlined_call_operand.hbm [shape: bf16[102,256], index: 2, kind: input, shape index: {}]   ;;  %s1877_s3 = inlined_call_operand.vmem [shape: f32[1,256], index: 3, kind: input, shape index: {}]   ;;  %s1878_s4 = inlined_call_operand.hbm [shape: bf16[256,128], index: 4, kind: input, shape index: {}]   ;;  %s1879_s5 = inlined_call_operand.hbm [shape: f32[1,128], index: 5, kind: input, shape index: {}]   ;;  %s1880_s6 = inlined_call_operand.vmem [shape: bf16[128,64], index: 6, kind: input, shape index: {}]   ;;  %s1881_s7 = inlined_call_operand.hbm [shape: f32[1,64], index: 7, kind: input, shape index: {}]   ;;  %s1882_s8 = inlined_call_operand.hbm [shape: bf16[23,64], index: 8, kind: input, shape index: {}]   ;;  %s1883_s9 = inlined_call_operand.hbm [shape: f32[1,64], index: 9, kind: input, shape index: {}]   ;;  %s1884_s10 = inlined_call_operand.vmem [shape: bf16[64,64], index: 10, kind: input, shape index: {}]   ;;  %s1885_s11 = inlined_call_operand.vmem [shape: f32[1,64], index: 11, kind: input, shape index: {}]   ;;  %s1886_s12 = inlined_call_operand.vmem [shape: bf16[64,64], index: 12, kind: input, shape index: {}]   ;;  %s1887_s13 = inlined_call_operand.vmem [shape: bf16[64,64], index: 13, kind: input, shape index: {}]   ;;  %s1888_s14 = inlined_call_operand.vmem [shape: f32[1,64], index: 14, kind: input, shape index: {}]   ;;  %s1889_s15 = inlined_call_operand.vmem [shape: bf16[64,64], index: 15, kind: input, shape index: {}]   ;;  %s1890_s16 = inlined_call_operand.hbm [shape: f32[8,256], index: 16, kind: output, shape index: {}]  }
   0x1   :  { %1892 = sst [smem:[#allocation23_spill]] %s1874_s0 }
   0x2   :  { %21 = vsyncpa [#allocation3], 0 }
   0x3   :  { %22 = vsyncpa [#allocation6], 0 }
   0x4   :  { %23 = vsyncpa [#allocation9], 0 }
   0x5   :  { %24 = vsyncpa [#allocation12], 0 }
   0x6   :  { %25 = vsyncpa [#allocation15], 0 }
   0x7   :  { %26 = vsyncpa [#allocation4], 0  ;;  %s1518_s21 = smov [#allocation5]   ;;  %s1519_s23 = smov [#allocation8]  }
   0x8   :  { %s43_s22 = sshll.u32 %s1518_s21, 4  ;;  %s66_s24 = sshll.u32 %s1519_s23, 4  ;;  %s44_s22 = int_to_ptr.vmem [resolvable:$true] %s43_s22  ;;  %s1620_s24 = int_to_ptr.vmem [resolvable:$true] %s66_s24 }
   0x9   :  { %s1308_s27 = scalar_lea.hbm %s1875_s1, 128 }
   0xa   :  { %p1309_p0 = scmp.ne.s32.totalorder %s1875_s1, %s1308_s27  ;;  %p1312_p1 = scmp.lt.u32.totalorder %s1308_s27, %s1875_s1 }
   0xc   :  { %p1314_p2 = pnand %p1312_p1, %p1309_p0 }
   0xe   :  { %1317 = shalt.err (!%p1314_p2)
}
   0xf   :  { %s1318_s17 = scalar_lea.vmem %s44_s22, 128  ;;  %p1323_p4 = scmp.lt.s32.totalorder %s44_s22, %s44_s22 }
  0x10   :  { %p1319_p3 = scmp.ne.s32.totalorder %s44_s22, %s1318_s17  ;;  %p1324_p5 = scmp.lt.s32.totalorder %s1318_s17, %s1318_s17 }
  0x12   :  { %p1325_p6 = por %p1324_p5, %p1323_p4 }
  0x14   :  { %p1326_p7 = pnand %p1325_p6, %p1319_p3 }
  0x16   :  { %1329 = shalt.err (!%p1326_p7)
}
  0x17   :  { %46 = dma.hbm_to_vmem [thread:$0]  %s1875_s1, 128, %s44_s22, [#allocation6]  }
  0x18   :  { %s1330_s23 = scalar_lea.hbm %s1878_s4, 2048 }
  0x19   :  { %p1331_p8 = scmp.ne.s32.totalorder %s1878_s4, %s1330_s23  ;;  %p1334_p9 = scmp.lt.u32.totalorder %s1330_s23, %s1878_s4 }
  0x1b   :  { %p1336_p10 = pnand %p1334_p9, %p1331_p8 }
  0x1d   :  { %1339 = shalt.err (!%p1336_p10)
}
  0x1e   :  { %s1340_s29 = scalar_lea.vmem %s1620_s24, 2048  ;;  %p1345_p12 = scmp.lt.s32.totalorder %s1620_s24, %s1620_s24 }
  0x1f   :  { %p1341_p11 = scmp.ne.s32.totalorder %s1620_s24, %s1340_s29  ;;  %p1346_p13 = scmp.lt.s32.totalorder %s1340_s29, %s1340_s29 }
  0x21   :  { %p1347_p0 = por %p1346_p13, %p1345_p12 }
  0x23   :  { %p1348_p1 = pnand %p1347_p0, %p1341_p11 }
  0x25   :  { %1351 = shalt.err (!%p1348_p1)
}
  0x26   :  { %s1520_s1 = smov 64   ;;  %s1521_s22 = smov 4  }
  0x27   :  { %72 = dma.hbm_to_vmem [thread:$0]  %s1878_s4, 2048, %s1620_s24, [#allocation9], %s1520_s1, %s1520_s1, %s1521_s22  }
  0x28   :  { %s1522_s17 = smov [#allocation11]   ;;  %s1523_s19 = smov [#allocation2]  }
  0x29   :  { %s91_s18 = sshll.u32 %s1522_s17, 4  ;;  %s33_s20 = sshll.u32 %s1523_s19, 4  ;;  %s92_s18 = int_to_ptr.vmem [resolvable:$true] %s91_s18  ;;  %s34_s20 = int_to_ptr.vmem [resolvable:$true] %s33_s20 }
  0x2a   :  { %s1352_s25 = scalar_lea.hbm %s1881_s7, 16 }
  0x2b   :  { %p1353_p2 = scmp.ne.s32.totalorder %s1881_s7, %s1352_s25  ;;  %p1356_p3 = scmp.lt.u32.totalorder %s1352_s25, %s1881_s7 }
  0x2d   :  { %p1358_p4 = pnand %p1356_p3, %p1353_p2 }
  0x2f   :  { %1361 = shalt.err (!%p1358_p4)
}
  0x30   :  { %s1362_s4 = scalar_lea.vmem %s92_s18, 16  ;;  %s1366_s24 = scalar_lea.vmem %s92_s18, 32 }
  0x31   :  { %p1363_p5 = scmp.ne.s32.totalorder %s92_s18, %s1362_s4  ;;  %p1367_p6 = scmp.lt.s32.totalorder %s92_s18, %s92_s18 }
  0x32   :  { %p1368_p7 = scmp.lt.s32.totalorder %s1366_s24, %s1362_s4 }
  0x34   :  { %p1369_p8 = por %p1368_p7, %p1367_p6 }
  0x36   :  { %p1370_p9 = pnand %p1369_p8, %p1363_p5 }
  0x38   :  { %1373 = shalt.err (!%p1370_p9)
}
  0x39   :  { %94 = dma.hbm_to_vmem [thread:$0]  %s1881_s7, 16, %s92_s18, [#allocation12]  }
  0x3a   :  { %s1893_s21 = sld [smem:[#allocation23_spill]] }
  0x40   :  { %s1374_s23 = scalar_lea.hbm %s1893_s21, 128 }
  0x41   :  { %p1375_p10 = scmp.ne.s32.totalorder %s1893_s21, %s1374_s23  ;;  %p1378_p11 = scmp.lt.u32.totalorder %s1374_s23, %s1893_s21 }
  0x43   :  { %p1380_p12 = pnand %p1378_p11, %p1375_p10 }
  0x45   :  { %1383 = shalt.err (!%p1380_p12)
}
  0x46   :  { %s1384_s29 = scalar_lea.vmem %s34_s20, 128  ;;  %p1389_p0 = scmp.lt.s32.totalorder %s34_s20, %s34_s20 }
  0x47   :  { %p1385_p13 = scmp.ne.s32.totalorder %s34_s20, %s1384_s29  ;;  %p1390_p1 = scmp.lt.s32.totalorder %s1384_s29, %s1384_s29 }
  0x49   :  { %p1391_p2 = por %p1390_p1, %p1389_p0 }
  0x4b   :  { %p1392_p3 = pnand %p1391_p2, %p1385_p13 }
  0x4d   :  { %1395 = shalt.err (!%p1392_p3)
}
  0x4e   :  { %36 = dma.hbm_to_vmem [thread:$0]  %s1893_s21, 128, %s34_s20, [#allocation3]  }
  0x4f   :  { %s1524_s4 = smov [#allocation7]   ;;  %s1396_s17 = scalar_lea.hbm %s1876_s2, 1664 }
  0x50   :  { %s52_s24 = sshll.u32 %s1524_s4, 4  ;;  %p1397_p4 = scmp.ne.s32.totalorder %s1876_s2, %s1396_s17  ;;  %s53_s24 = int_to_ptr.vmem [resolvable:$true] %s52_s24 }
  0x51   :  { %p1400_p5 = scmp.lt.u32.totalorder %s1396_s17, %s1876_s2 }
  0x53   :  { %p1402_p6 = pnand %p1400_p5, %p1397_p4 }
  0x55   :  { %1405 = shalt.err (!%p1402_p6)
}
  0x56   :  { %s1406_s27 = scalar_lea.vmem %s53_s24, 1664  ;;  %p1411_p8 = scmp.lt.s32.totalorder %s53_s24, %s53_s24 }
  0x57   :  { %p1407_p7 = scmp.ne.s32.totalorder %s53_s24, %s1406_s27  ;;  %p1412_p9 = scmp.lt.s32.totalorder %s1406_s27, %s1406_s27 }
  0x59   :  { %p1413_p10 = por %p1412_p9, %p1411_p8 }
  0x5b   :  { %p1414_p11 = pnand %p1413_p10, %p1407_p7 }
  0x5d   :  { %1417 = shalt.err (!%p1414_p11)
}
  0x5e   :  { %s1525_s20 = smov 128   ;;  %s1526_s21 = smov 8  }
  0x5f   :  { %58 = dma.hbm_to_vmem [thread:$0]  %s1876_s2, 1664, %s53_s24, [#allocation6], %s1525_s20, %s1525_s20, %s1526_s21  }
  0x60   :  { %s1527_s7 = smov [#allocation10]   ;;  %s1528_s4 = smov [#allocation13]  }
  0x61   :  { %s79_s18 = sshll.u32 %s1527_s7, 4  ;;  %s100_s30 = sshll.u32 %s1528_s4, 4  ;;  %s80_s18 = int_to_ptr.vmem [resolvable:$true] %s79_s18  ;;  %s101_s30 = int_to_ptr.vmem [resolvable:$true] %s100_s30 }
  0x62   :  { %s1418_s19 = scalar_lea.hbm %s1879_s5, 16 }
  0x63   :  { %p1419_p12 = scmp.ne.s32.totalorder %s1879_s5, %s1418_s19  ;;  %p1422_p13 = scmp.lt.u32.totalorder %s1418_s19, %s1879_s5 }
  0x65   :  { %p1424_p0 = pnand %p1422_p13, %p1419_p12 }
  0x67   :  { %1427 = shalt.err (!%p1424_p0)
}
  0x68   :  { %s1428_s2 = scalar_lea.vmem %s80_s18, 16  ;;  %s1432_s24 = scalar_lea.vmem %s80_s18, 32 }
  0x69   :  { %p1429_p1 = scmp.ne.s32.totalorder %s80_s18, %s1428_s2  ;;  %p1433_p2 = scmp.lt.s32.totalorder %s80_s18, %s80_s18 }
  0x6a   :  { %p1434_p3 = scmp.lt.s32.totalorder %s1432_s24, %s1428_s2 }
  0x6c   :  { %p1435_p4 = por %p1434_p3, %p1433_p2 }
  0x6e   :  { %p1436_p5 = pnand %p1435_p4, %p1429_p1 }
  0x70   :  { %1439 = shalt.err (!%p1436_p5)
}
  0x71   :  { %82 = dma.hbm_to_vmem [thread:$0]  %s1879_s5, 16, %s80_s18, [#allocation9]  }
  0x72   :  { %s1440_s7 = scalar_lea.hbm %s1882_s8, 192 }
  0x73   :  { %p1441_p6 = scmp.ne.s32.totalorder %s1882_s8, %s1440_s7  ;;  %p1444_p7 = scmp.lt.u32.totalorder %s1440_s7, %s1882_s8 }
  0x75   :  { %p1446_p8 = pnand %p1444_p7, %p1441_p6 }
  0x77   :  { %1449 = shalt.err (!%p1446_p8)
}
  0x78   :  { %s1450_s23 = scalar_lea.vmem %s101_s30, 192  ;;  %p1455_p10 = scmp.lt.s32.totalorder %s101_s30, %s101_s30 }
  0x79   :  { %p1451_p9 = scmp.ne.s32.totalorder %s101_s30, %s1450_s23  ;;  %p1456_p11 = scmp.lt.s32.totalorder %s1450_s23, %s1450_s23 }
  0x7b   :  { %p1457_p12 = por %p1456_p11, %p1455_p10 }
  0x7d   :  { %p1458_p13 = pnand %p1457_p12, %p1451_p9 }
  0x7f   :  { %1461 = shalt.err (!%p1458_p13)
}
  0x80   :  { %106 = dma.hbm_to_vmem [thread:$0]  %s1882_s8, 192, %s101_s30, [#allocation12], %s1520_s1, %s1520_s1, %s1521_s22  }
  0x81   :  { %s1529_s26 = smov [#allocation14]   ;;  %s1462_s24 = scalar_lea.hbm %s1883_s9, 16 }
  0x82   :  { %s113_s25 = sshll.u32 %s1529_s26, 4  ;;  %p1463_p0 = scmp.ne.s32.totalorder %s1883_s9, %s1462_s24  ;;  %s114_s25 = int_to_ptr.vmem [resolvable:$true] %s113_s25 }
  0x83   :  { %p1466_p1 = scmp.lt.u32.totalorder %s1462_s24, %s1883_s9 }
  0x85   :  { %p1468_p2 = pnand %p1466_p1, %p1463_p0 }
  0x87   :  { %1471 = shalt.err (!%p1468_p2)
}
  0x88   :  { %s1472_s7 = scalar_lea.vmem %s114_s25, 16  ;;  %s1476_s8 = scalar_lea.vmem %s114_s25, 32 }
  0x89   :  { %p1473_p3 = scmp.ne.s32.totalorder %s114_s25, %s1472_s7  ;;  %p1477_p4 = scmp.lt.s32.totalorder %s114_s25, %s114_s25 }
  0x8a   :  { %p1478_p5 = scmp.lt.s32.totalorder %s1476_s8, %s1472_s7 }
  0x8c   :  { %p1479_p6 = por %p1478_p5, %p1477_p4 }
  0x8e   :  { %p1480_p7 = pnand %p1479_p6, %p1473_p3 }
  0x90   :  { %1483 = shalt.err (!%p1480_p7)
}
  0x91   :  { %116 = dma.hbm_to_vmem [thread:$0]  %s1883_s9, 16, %s114_s25, [#allocation15]  }
  0x92   :  { %1506 = dma.done.wait [#allocation3], 128  }
  0x93   :  { %1507 = vsyncadd [#allocation3], 4294967168 }
  0x94   :  { %1508 = dma.done.wait [#allocation6], 1792  }
  0x95   :  { %1509 = vsyncadd [#allocation6], 4294965504 }
  0x96   :  { %1510 = dma.done.wait [#allocation9], 2064  }
  0x97   :  { %1511 = vsyncadd [#allocation9], 4294965232 }
  0x98   :  { %1512 = dma.done.wait [#allocation12], 208  }
  0x99   :  { %1513 = vsyncadd [#allocation12], 4294967088 }
  0x9a   :  { %1514 = dma.done.wait [#allocation15], 16  }
  0x9b   :  { %1515 = vsyncadd [#allocation15], 4294967280  ;;  %v1530_v0 = vmov 0   ;;  %v1246_v1 = vld [vmem:[#allocation7 + $0x4] ss:$8 sps:$4 sm:$0xff]   ;;  %v1268_v13 = vld [vmem:[#allocation8 + $0x48] sm:$0xff]   ;;  %v171_v42 = vlaneseq }
  0x9c   :  { %289 = vmatprep.mubr.bf16.mxu0 %v1530_v0  ;;  %v1248_v2 = vld [vmem:[#allocation7] ss:$8 sps:$4 sm:$0xff]   ;;  %257 = vmatprep.subr.bf16.mxu0 %v1246_v1  ;;  %v1249_v3 = vld [vmem:[#allocation7 + $0x14] ss:$8 sps:$4 sm:$0xff]   ;;  %v1251_v4 = vld [vmem:[#allocation7 + $0x10] ss:$8 sps:$4 sm:$0xff]  }
  0x9d   :  { %258 = vmatpush1.bf16.msra.mxu0 %v1248_v2  ;;  %v1252_v5 = vld [vmem:[#allocation7 + $0x24] ss:$8 sps:$4 sm:$0xff]   ;;  %v1254_v6 = vld [vmem:[#allocation7 + $0x20] ss:$8 sps:$4 sm:$0xff]   ;;  %v1255_v7 = vld [vmem:[#allocation7 + $0x34] ss:$8 sps:$4 sm:$0xff]  }
  0x9e   :  { %259 = vmatprep.subr.bf16.mxu0 %v1249_v3  ;;  %v1257_v8 = vld [vmem:[#allocation7 + $0x30] ss:$8 sps:$4 sm:$0xff]   ;;  %v1266_v9 = vld [vmem:[#allocation8 + $0x40] sm:$0xff]   ;;  %v168_v12 = vld [vmem:[#allocation7 + $0x60] sm:$0x77]  ;;  %vm250_vm0 = vcmask 1042432  }
  0x9f   :  { %v1258_v10 = vld [vmem:[#allocation7 + $0x44] ss:$8 sps:$4 sm:$0xff]   ;;  %1099 = vmatprep.subr.bf16.mxu1 %v1266_v9  ;;  %v1269_v14 = vld [vmem:[#allocation8 + $0x8] sm:$0xff]   ;;  %v1270_v15 = vld [vmem:[#allocation8 + $0x50] sm:$0xff]   ;;  %v1043_v18 = vcombine.low %v168_v12, %v168_v12  ;;  %v1044_v22 = vcombine.high %v168_v12, %v168_v12  ;;  %vm246_vm1 = vcmask 834560   ;;  %v1531_v36 = vmov 0.0  }
  0xa0   :  { %v1267_v11 = vld [vmem:[#allocation8] sm:$0xff]   ;;  %v1261_v17 = vld [vmem:[#allocation7 + $0x54] ss:$8 sps:$4 sm:$0xff]   ;;  %v1272_v20 = vld [vmem:[#allocation8 + $0x58] sm:$0xff]   ;;  %v172_v43 = vshrl.u32 %v171_v42, 7  ;;  %vm1532_vm4 = vmmov 0  }
  0xa1   :  { %260 = vmatpush1.bf16.msra.mxu0 %v1251_v4  ;;  %1100 = vmatpush3.bf16.msra.mxu1 %v1267_v11  ;;  %v1260_v16 = vld [vmem:[#allocation7 + $0x40] ss:$8 sps:$4 sm:$0xff]   ;;  %v1271_v19 = vld [vmem:[#allocation8 + $0x10] sm:$0xff]   ;;  %v252_v23 = vsel %vm250_vm0, %v1043_v18, 0  ;;  %v154_v26 = vld [vmem:[#allocation2] sm:$0xff]  ;;  %vm624_vm5 = vcmask 1043456  }
  0xa2   :  { %261 = vmatprep.subr.bf16.mxu0 %v1252_v5  ;;  %1101 = vmatprep.subr.bf16.mxu1 %v1268_v13  ;;  %v1263_v21 = vld [vmem:[#allocation7 + $0x50] ss:$8 sps:$4 sm:$0xff]   ;;  %v1273_v24 = vld [vmem:[#allocation8 + $0x18] sm:$0xff]   ;;  %v1274_v25 = vld [vmem:[#allocation8 + $0x60] sm:$0xff]   ;;  %v155_v29 = vpack.c.bf16 %v154_v26, %v154_v26  ;;  %v173_v44 = vsub.s32 0, %v172_v43  ;;  %v177_v46 = vsub.s32 1, %v172_v43 }
  0xa3   :  { %v1275_v27 = vld [vmem:[#allocation8 + $0x20] sm:$0xff]   ;;  %v1276_v28 = vld [vmem:[#allocation8 + $0x68] sm:$0xff]   ;;  %v1278_v31 = vld [vmem:[#allocation8 + $0x70] sm:$0xff]   ;;  %vm620_vm7 = vcmask 187392   ;;  %vm713_vm9 = vcmask 523264   ;;  %vm1004_vm12 = vcmask 1048064  }
  0xa4   :  { %v1277_v30 = vld [vmem:[#allocation8 + $0x28] sm:$0xff]   ;;  %v1279_v32 = vld [vmem:[#allocation8 + $0x30] sm:$0xff]   ;;  %v1280_v33 = vld [vmem:[#allocation8 + $0x78] sm:$0xff]  }
  0xa5   :  { %262 = vmatpush1.bf16.msra.mxu0 %v1254_v6  ;;  %1102 = vmatpush3.bf16.msra.mxu1 %v1269_v14  ;;  %v1281_v34 = vld [vmem:[#allocation8 + $0x38] sm:$0xff]   ;;  %v1282_v35 = vld [vmem:[%s1880_s6] sm:$0xff]   ;;  %v1283_v37 = vld [vmem:[%s1880_s6 + $0x8] sm:$0xff]   ;;  %v1533_v6 = vmov 65535  }
  0xa6   :  { %263 = vmatprep.subr.bf16.mxu0 %v1255_v7  ;;  %1103 = vmatprep.subr.bf16.mxu1 %v1270_v15  ;;  %v1284_v38 = vld [vmem:[%s1880_s6 + $0x10] sm:$0xff]   ;;  %v1285_v39 = vld [vmem:[%s1880_s6 + $0x18] sm:$0xff]   ;;  %v1286_v40 = vld [vmem:[%s1880_s6 + $0x20] sm:$0xff]   ;;  %v625_v7 = vsel %vm250_vm0, 4294967295, %v1533_v6 }
  0xa7   :  { %v1287_v41 = vld [vmem:[%s1880_s6 + $0x28] sm:$0xff]   ;;  %v169_v45 = vld [vmem:[%s1877_s3] sm:$0x3]  ;;  %v1288_v61 = vld [vmem:[%s1880_s6 + $0x30] sm:$0xff]   ;;  %v626_v12 = vsel %vm624_vm5, %v625_v7, 0 }
  0xa8   :  { %v174_v47 = vrot.slane %v169_v45, %v173_v44  ;;  %v178_v48 = vrot.slane %v169_v45, %v177_v46  ;;  %v1289_v62 = vld [vmem:[%s1880_s6 + $0x38] sm:$0xff]   ;;  %v1291_v11 = vld [vmem:[#allocation13 + $0x8] ss:$0 sps:$4 sm:$0xff]   ;;  %v599_v15 = vld [vmem:[#allocation5] sm:$0xff] }
  0xa9   :  { %264 = vmatpush1.bf16.msra.mxu0 %v1257_v8  ;;  %1104 = vmatpush3.bf16.msra.mxu1 %v1271_v19  ;;  %v1047_v0 = vld [vmem:[#allocation10] ss:$0 sm:$0xff]  ;;  %v628_v14 = vand.u32 %v1291_v11, %v626_v12  ;;  %v1293_v18 = vld [vmem:[%s1886_s12 + $0x8] sm:$0xff]   ;;  %v1294_v19 = vld [vmem:[%s1884_s10] sm:$0xff]  }
  0xaa   :  { %265 = vmatprep.subr.bf16.mxu0 %v1258_v10  ;;  %1105 = vmatprep.subr.bf16.mxu1 %v1272_v20  ;;  %v1290_v10 = vld [vmem:[#allocation13] sm:$0xff]   ;;  %v1295_v20 = vld [vmem:[%s1886_s12 + $0x10] sm:$0xff]   ;;  %v1301_v45 = vld [vmem:[%s1887_s13 + $0x8] sm:$0xff]  }
  0xab   :  { %v1300_v44 = vld [vmem:[%s1887_s13] sm:$0xff]   ;;  %v1302_v46 = vld [vmem:[%s1887_s13 + $0x10] sm:$0xff]  }
  0xad   :  { %266 = vmatpush1.bf16.msra.mxu0 %v1260_v16  ;;  %1106 = vmatpush3.bf16.msra.mxu1 %v1273_v24  ;;  %v600_v16 = vpack.c.bf16 %v599_v15, %v599_v15  ;;  %v1299_v24 = vld [vmem:[%s1884_s10 + $0x18] sm:$0xff]  }
  0xae   :  { %267 = vmatprep.subr.bf16.mxu0 %v1261_v17  ;;  %1107 = vmatprep.subr.bf16.mxu1 %v1274_v25  ;;  %v1292_v17 = vld [vmem:[%s1886_s12] sm:$0xff]   ;;  %v1064_v25 = vld [vmem:[#allocation11] ss:$0 sm:$0xff] }
  0xb1   :  { %268 = vmatpush1.bf16.msra.mxu0 %v1263_v21  ;;  %1108 = vmatpush3.bf16.msra.mxu1 %v1275_v27  ;;  %v1296_v21 = vld [vmem:[%s1884_s10 + $0x8] sm:$0xff]  }
  0xb2   :  { %1045 = vmatprep.subr.msk.bf16.mxu0 %vm250_vm0, %v1044_v22  ;;  %1109 = vmatprep.subr.bf16.mxu1 %v1276_v28  ;;  %v1297_v22 = vld [vmem:[%s1886_s12 + $0x18] sm:$0xff]  }
  0xb5   :  { %270 = vmatpush1.bf16.msra.mxu0 %v252_v23  ;;  %1110 = vmatpush3.bf16.msra.mxu1 %v1277_v30  ;;  %v1298_v23 = vld [vmem:[%s1884_s10 + $0x10] sm:$0xff]  }
  0xb6   :  { %1111 = vmatprep.subr.bf16.mxu1 %v1278_v31  ;;  %1153 = vmatprep.subr.bf16.mxu0 %v1531_v36 }
  0xb8   :  { %1046 = vmatmul.mubr.msk.bf16.vlgmr.msra.gmra.mrb[0].mxu0 %vm246_vm1, %v155_v29 }
  0xb9   :  { %1112 = vmatpush3.bf16.msra.mxu1 %v1279_v32  ;;  %1154 = vmatpush3.bf16.msra.mxu0 %v1282_v35 }
  0xba   :  { %1113 = vmatprep.subr.bf16.mxu1 %v1280_v33  ;;  %1155 = vmatprep.subr.bf16.mxu0 %v1531_v36 }
  0xbb   :  { %1169 = vmatprep.mubr.msk.bf16.mxu0 %vm1532_vm4, %v1531_v36 }
  0xbd   :  { %1114 = vmatpush3.bf16.msra.mxu1 %v1281_v34  ;;  %1156 = vmatpush3.bf16.msra.mxu0 %v1283_v37  ;;  %v1073_v34 = vld [vmem:[#allocation14] ss:$0 sm:$0xff] }
  0xbe   :  { %1181 = vmatprep.subr.bf16.mxu1 %v1531_v36  ;;  %1157 = vmatprep.subr.bf16.mxu0 %v1531_v36 }
  0xc1   :  { %1158 = vmatpush3.bf16.msra.mxu0 %v1284_v38 }
  0xc2   :  { %1159 = vmatprep.subr.bf16.mxu0 %v1531_v36 }
  0xc5   :  { %1160 = vmatpush3.bf16.msra.mxu0 %v1285_v39 }
  0xc6   :  { %1161 = vmatprep.subr.bf16.mxu0 %v1531_v36 }
  0xc9   :  { %1162 = vmatpush3.bf16.msra.mxu0 %v1286_v40 }
  0xca   :  { %1163 = vmatprep.subr.bf16.mxu0 %v1531_v36 }
  0xcd   :  { %1164 = vmatpush3.bf16.msra.mxu0 %v1287_v41 }
  0xce   :  { %1165 = vmatprep.subr.bf16.mxu0 %v1531_v36 }
  0xd1   :  { %1166 = vmatpush3.bf16.msra.mxu0 %v1288_v61 }
  0xd2   :  { %1167 = vmatprep.subr.bf16.mxu0 %v1531_v36 }
  0xd5   :  { %1168 = vmatpush3.bf16.msra.mxu0 %v1289_v62  ;;  %v1305_v62 = vld [vmem:[%s1889_s15 + $0x8] sm:$0xff]  }
  0xd6   :  { %1173 = vmatprep.subr.bf16.mxu0 %v1531_v36 }
 0x18b   :  { %v291_v49 = vpop.f32.mrb[0].mxu0 }
 0x18c   :  { %v292_v50 = vadd.f32 %v291_v49, %v174_v47  ;;  %v293_v51 = vpop.f32.mrb[1].mxu0  ;;  %v1303_v47 = vld [vmem:[%s1887_s13 + $0x18] sm:$0xff]  }
 0x18d   :  { %v294_v52 = vadd.f32 %v293_v51, %v178_v48  ;;  %v295_v53 = vpop.f32.mrb[2].mxu0 }
 0x18e   :  { %vm298_vm2 = vcmp.ge.f32.partialorder %v292_v50, 0.0  ;;  %v300_v54 = vmul.f32 0.01, %v292_v50  ;;  %v296_v55 = vpop.f32.mrb[3].mxu0 }
 0x18f   :  { %vm299_vm3 = vcmp.ge.f32.partialorder %v294_v52, 0.0  ;;  %v301_v56 = vmul.f32 0.01, %v294_v52 }
 0x190   :  { %v302_v57 = vsel %vm298_vm2, %v292_v50, %v300_v54 }
 0x191   :  { %v303_v58 = vsel %vm299_vm3, %v294_v52, %v301_v56  ;;  %v304_v60 = vpack.c.bf16 %v302_v57, %v302_v57  ;;  %v1077_v52 = vld [vmem:[%s1885_s11] ss:$0 sm:$0xff] }
 0x192   :  { %v305_v59 = vpack.c.bf16 %v303_v58, %v303_v58 }
 0x194   :  { %473 = vmatprep.mubr.bf16.mxu1 %v305_v59 }
 0x195   :  { %474 = vmatmul.mubr.bf16.vlgmr.msra.gmra.mrb[0].mxu1 %v304_v60  ;;  %v1304_v60 = vld [vmem:[%s1889_s15] sm:$0xff]  }
 0x196   :  { %1189 = vmatprep.mubr.msk.bf16.mxu1 %vm1532_vm4, %v1531_v36  ;;  %1182 = vmatpush3.bf16.msra.mxu1 %v1294_v19 }
 0x197   :  { %1183 = vmatprep.subr.bf16.mxu1 %v1531_v36 }
 0x19a   :  { %1184 = vmatpush3.bf16.msra.mxu1 %v1296_v21 }
 0x19b   :  { %1185 = vmatprep.subr.bf16.mxu1 %v1531_v36 }
 0x19e   :  { %1186 = vmatpush3.bf16.msra.mxu1 %v1298_v23 }
 0x19f   :  { %1187 = vmatprep.subr.bf16.mxu1 %v1531_v36 }
 0x1a2   :  { %1188 = vmatpush3.bf16.msra.mxu1 %v1299_v24 }
 0x1a3   :  { %1193 = vmatprep.subr.bf16.mxu1 %v1531_v36 }
 0x268   :  { %v1115_v63 = vpop.f32.mrb[0].mxu1 }
 0x269   :  { %v1116_v1 = vpop.f32.mrb[1].mxu1 }
 0x26a   :  { %v1117_v2 = vadd.f32 %v1116_v1, %v1115_v63  ;;  %v1118_v3 = vpop.f32.mrb[2].mxu1  ;;  %v1306_v63 = vld [vmem:[%s1889_s15 + $0x10] sm:$0xff]  }
 0x26b   :  { %v1119_v4 = vpop.f32.mrb[3].mxu1  ;;  %v1093_v3 = vld [vmem:[%s1888_s14] ss:$0 sm:$0xff]  ;;  %s1534_s14 = smov [#allocation16]  }
 0x26c   :  { %v476_v5 = vadd.f32 %v1117_v2, %v1047_v0  ;;  %v1307_v0 = vld [vmem:[%s1889_s15 + $0x18] sm:$0xff]   ;;  %s1018_s15 = sshll.u32 %s1534_s14, 4  ;;  %s1019_s15 = int_to_ptr.vmem [resolvable:$true] %s1018_s15 }
 0x26d   :  { %s1484_s19 = scalar_lea.vmem %s1019_s15, 256  ;;  %p1489_p9 = scmp.lt.s32.totalorder %s1019_s15, %s1019_s15 }
 0x26e   :  { %vm481_vm6 = vcmp.ge.f32.partialorder %v476_v5, 0.0  ;;  %v482_v8 = vmul.f32 0.01, %v476_v5  ;;  %p1485_p8 = scmp.ne.s32.totalorder %s1019_s15, %s1484_s19  ;;  %p1490_p10 = scmp.lt.s32.totalorder %s1484_s19, %s1484_s19 }
 0x270   :  { %v483_v9 = vsel %vm481_vm6, %v476_v5, %v482_v8  ;;  %p1491_p11 = por %p1490_p10, %p1489_p9 }
 0x271   :  { %v484_v13 = vpack.c.bf16 %v483_v9, %v483_v9 }
 0x272   :  { %p1492_p12 = pnand %p1491_p11, %p1485_p8 }
 0x273   :  { %1170 = vmatmul.mubr.bf16.vlgmr.msra.gmra.mrb[4].mxu0 %v484_v13 }
 0x274   :  { %1174 = vmatpush3.bf16.msra.mxu0 %v1290_v10  ;;  %1177 = vmatprep.mubr.msk.bf16.mxu0 %vm1532_vm4, %v1531_v36 }
 0x275   :  { %1175 = vmatprep.subr.bf16.mxu0 %v1531_v36 }
 0x278   :  { %1176 = vmatpush3.bf16.msra.mxu0 %v628_v14 }
 0x279   :  { %1205 = vmatprep.subr.bf16.mxu0 %v1531_v36 }
 0x27b   :  { %1178 = vmatmul.mubr.msk.bf16.vlgmr.msra.gmra.mrb[8].mxu0 %vm620_vm7, %v600_v16 }
 0x27c   :  { %1206 = vmatpush3.bf16.msra.mxu0 %v1292_v17  ;;  %1213 = vmatprep.mubr.msk.bf16.mxu0 %vm1532_vm4, %v1531_v36 }
 0x27d   :  { %1207 = vmatprep.subr.bf16.mxu0 %v1531_v36 }
 0x280   :  { %1208 = vmatpush3.bf16.msra.mxu0 %v1293_v18 }
 0x281   :  { %1209 = vmatprep.subr.bf16.mxu0 %v1531_v36 }
 0x284   :  { %1210 = vmatpush3.bf16.msra.mxu0 %v1295_v20 }
 0x285   :  { %1211 = vmatprep.subr.bf16.mxu0 %v1531_v36 }
 0x288   :  { %1212 = vmatpush3.bf16.msra.mxu0 %v1297_v22 }
 0x346   :  { %v590_v26 = vpop.f32.mrb[4].mxu0 }
 0x347   :  { %v591_v27 = vadd.f32 %v1064_v25, %v590_v26  ;;  %v1171_v28 = vpop.f32.mrb[5].mxu0 }
 0x348   :  { %v593_v29 = vpop.f32.mrb[6].mxu0 }
 0x349   :  { %vm596_vm8 = vcmp.ge.f32.partialorder %v591_v27, 0.0  ;;  %v597_v30 = vmul.f32 0.01, %v591_v27  ;;  %v1172_v31 = vpop.f32.mrb[7].mxu0 }
 0x34b   :  { %v598_v32 = vsel %vm596_vm8, %v591_v27, %v597_v30 }
 0x34c   :  { %v760_v33 = vpack.c.bf16 %v598_v32, %v598_v32  ;;  %999 = vst.msk [vmem:[#allocation16] sm:$0xff] %vm713_vm9, %v598_v32 }
 0x34e   :  { %v664_v35 = vpop.f32.mrb[8].mxu0  ;;  %1214 = vmatmul.mubr.msk.bf16.vlgmr.msra.gmra.mrb[12].mxu0 %vm713_vm9, %v760_v33 }
 0x34f   :  { %v665_v37 = vadd.f32 %v1073_v34, %v664_v35  ;;  %v1179_v38 = vpop.f32.mrb[9].mxu0 }
 0x350   :  { %v667_v39 = vpop.f32.mrb[10].mxu0 }
 0x351   :  { %vm670_vm10 = vcmp.ge.f32.partialorder %v665_v37, 0.0  ;;  %v671_v40 = vmul.f32 0.01, %v665_v37  ;;  %v1180_v41 = vpop.f32.mrb[11].mxu0 }
 0x353   :  { %v672_v42 = vsel %vm670_vm10, %v665_v37, %v671_v40 }
 0x354   :  { %v673_v43 = vpack.c.bf16 %v672_v42, %v672_v42 }
 0x356   :  { %1190 = vmatmul.mubr.msk.bf16.vlgmr.msra.gmra.mrb[4].mxu1 %vm713_vm9, %v673_v43 }
 0x357   :  { %1201 = vmatprep.mubr.msk.bf16.mxu1 %vm1532_vm4, %v1531_v36  ;;  %1194 = vmatpush3.bf16.msra.mxu1 %v1300_v44 }
 0x358   :  { %1195 = vmatprep.subr.bf16.mxu1 %v1531_v36 }
 0x35b   :  { %1196 = vmatpush3.bf16.msra.mxu1 %v1301_v45 }
 0x35c   :  { %1197 = vmatprep.subr.bf16.mxu1 %v1531_v36 }
 0x35f   :  { %1198 = vmatpush3.bf16.msra.mxu1 %v1302_v46 }
 0x360   :  { %1199 = vmatprep.subr.bf16.mxu1 %v1531_v36 }
 0x363   :  { %1200 = vmatpush3.bf16.msra.mxu1 %v1303_v47 }
 0x364   :  { %1217 = vmatprep.subr.bf16.mxu1 %v1531_v36 }
 0x421   :  { %v906_v48 = vpop.f32.mrb[12].mxu0 }
 0x422   :  { %v1215_v49 = vpop.f32.mrb[13].mxu0 }
 0x423   :  { %v909_v50 = vpop.f32.mrb[14].mxu0 }
 0x424   :  { %v1216_v51 = vpop.f32.mrb[15].mxu0 }
 0x429   :  { %v751_v53 = vpop.f32.mrb[4].mxu1 }
 0x42a   :  { %v752_v54 = vadd.f32 %v1077_v52, %v751_v53  ;;  %v1191_v55 = vpop.f32.mrb[5].mxu1 }
 0x42b   :  { %v754_v56 = vpop.f32.mrb[6].mxu1 }
 0x42c   :  { %v1192_v57 = vpop.f32.mrb[7].mxu1  ;;  %vm757_vm11 = vcmp.ge.f32.partialorder %v752_v54, 0.0  ;;  %v758_v58 = vmul.f32 0.01, %v752_v54 }
 0x42e   :  { %v759_v59 = vsel %vm757_vm11, %v752_v54, %v758_v58 }
 0x42f   :  { %1001 = vrot.lane.b32.xlu0 %v759_v59, %s1520_s1  ;;  %v769_v61 = vpack.c.bf16 %v759_v59, %v759_v59 }
 0x431   :  { %1202 = vmatmul.mubr.msk.bf16.vlgmr.msra.gmra.mrb[8].mxu1 %vm713_vm9, %v769_v61 }
 0x432   :  { %1218 = vmatpush3.bf16.msra.mxu1 %v1304_v60  ;;  %1225 = vmatprep.mubr.msk.bf16.mxu1 %vm1532_vm4, %v1531_v36 }
 0x433   :  { %1219 = vmatprep.subr.bf16.mxu1 %v1531_v36 }
 0x436   :  { %1220 = vmatpush3.bf16.msra.mxu1 %v1305_v62 }
 0x437   :  { %1221 = vmatprep.subr.bf16.mxu1 %v1531_v36 }
 0x43a   :  { %1222 = vmatpush3.bf16.msra.mxu1 %v1306_v63 }
 0x43b   :  { %1223 = vmatprep.subr.bf16.mxu1 %v1531_v36 }
 0x43e   :  { %1224 = vmatpush3.bf16.msra.mxu1 %v1307_v0 }
 0x4a1   :  { %v1002_v1 = vpop.permute.xlu0 %1001 }
 0x4a2   :  { %1005 = vst.msk [vmem:[#allocation16] sm:$0xff] %vm1004_vm12, %v1002_v1 }
 0x504   :  { %v839_v2 = vpop.f32.mrb[8].mxu1 }
 0x505   :  { %v907_v4 = vadd.f32 %v906_v48, %v839_v2  ;;  %v1203_v5 = vpop.f32.mrb[9].mxu1 }
 0x506   :  { %v842_v6 = vpop.f32.mrb[10].mxu1 }
 0x507   :  { %v919_v7 = vadd.f32 %v1093_v3, %v907_v4  ;;  %v1204_v8 = vpop.f32.mrb[11].mxu1 }
 0x509   :  { %vm920_vm13 = vcmp.ge.f32.partialorder %v919_v7, 0.0  ;;  %v921_v36 = vmul.f32 0.01, %v919_v7 }
 0x50b   :  { %v922_v9 = vsel %vm920_vm13, %v919_v7, %v921_v36 }
 0x50c   :  { %v923_v10 = vpack.c.bf16 %v922_v9, %v922_v9  ;;  %1006 = vst.msk [vmem:[#allocation16 + $0x8] sm:$0xff] %vm713_vm9, %v922_v9 }
 0x50e   :  { %1226 = vmatmul.mubr.msk.bf16.vlgmr.msra.gmra.mrb[12].mxu1 %vm713_vm9, %v923_v10 }
 0x5e1   :  { %v993_v11 = vpop.f32.mrb[12].mxu1 }
 0x5e2   :  { %1008 = vrot.lane.b32.xlu0 %v993_v11, %s1520_s1  ;;  %v1227_v12 = vpop.f32.mrb[13].mxu1 }
 0x5e3   :  { %v996_v13 = vpop.f32.mrb[14].mxu1 }
 0x5e4   :  { %v1228_v14 = vpop.f32.mrb[15].mxu1 }
 0x654   :  { %v1009_v15 = vpop.permute.xlu0 %1008 }
 0x655   :  { %1011 = vst.msk [vmem:[#allocation16 + $0x8] sm:$0xff] %vm1004_vm12, %v1009_v15 }
 0x656   :  { %1495 = shalt.err (!%p1492_p12)
}
 0x657   :  { %s1496_s1 = scalar_lea.hbm %s1890_s16, 256 }
 0x658   :  { %p1497_p13 = scmp.ne.s32.totalorder %s1890_s16, %s1496_s1  ;;  %p1500_p0 = scmp.lt.u32.totalorder %s1496_s1, %s1890_s16 }
 0x65a   :  { %p1502_p1 = pnand %p1500_p0, %p1497_p13 }
 0x65c   :  { %1505 = shalt.err (!%p1502_p1)
}
 0x65d   :  { %1021 = dma.vmem_to_hbm [thread:$0]  %s1019_s15, 256, %s1890_s16, [#allocation4]  }
 0x65e   :  { %1516 = dma.done.wait [#allocation4], 256  }
 0x65f   :  { %1517 = vsyncadd [#allocation4], 4294967040 }
 0x660   :  { %1025 = vsyncpa [#allocation3], 1 }
 0x661   :  { %1026 = vsyncpa [#allocation6], 1 }
 0x662   :  { %1027 = vsyncpa [#allocation9], 1 }
 0x663   :  { %1028 = vsyncpa [#allocation12], 1 }
 0x664   :  { %1029 = vsyncpa [#allocation15], 1 }
 0x665   :  { %1030 = vsyncpa [#allocation4], 1 }

</bundles_post_ra>
